<compile_context>
chip_gen: v5e
topology: v5e:2x2
jax: 0.10.0
libtpu: 0.0.40
codegen_flags: <defaults>
</compile_context>

<pallas_src>
import functools
import math

import jax
import jax.numpy as jnp
from jax import lax
from jax.experimental import pallas as pl
from jax.experimental.pallas import tpu as pltpu


# ------------------------------ tiling helper -------------------------------
def _pick_tile(dim, target):
    """Largest tile <= target that evenly divides dim (falls back to dim)."""
    if dim <= target:
        return dim
    t = target
    while t > 8 and dim % t:
        t //= 2
    return t if dim % t == 0 else dim


# ----------------------- fused QKV projection kernel ------------------------
def _make_qkv_kernel(compute_dtype):
    def kernel(x_ref, wq_ref, wk_ref, wv_ref, bq_ref, bk_ref, bv_ref,
               q_ref, k_ref, v_ref, accq, acck, accv):
        @pl.when(pl.program_id(2) == 0)
        def _init():
            accq[...] = jnp.zeros_like(accq)
            acck[...] = jnp.zeros_like(acck)
            accv[...] = jnp.zeros_like(accv)

        xb = x_ref[...].astype(compute_dtype)       # read activation tile ONCE
        accq[...] += jnp.dot(xb, wq_ref[...].astype(compute_dtype),
                             preferred_element_type=jnp.float32)
        acck[...] += jnp.dot(xb, wk_ref[...].astype(compute_dtype),
                             preferred_element_type=jnp.float32)
        accv[...] += jnp.dot(xb, wv_ref[...].astype(compute_dtype),
                             preferred_element_type=jnp.float32)

        @pl.when(pl.program_id(2) == pl.num_programs(2) - 1)
        def _finalize():
            q_ref[...] = (accq[...] + bq_ref[...]).astype(q_ref.dtype)
            k_ref[...] = (acck[...] + bk_ref[...]).astype(k_ref.dtype)
            v_ref[...] = (accv[...] + bv_ref[...]).astype(v_ref.dtype)

    return kernel


def pallas_qkv_proj(x2d, wt_q, wt_k, wt_v, b_q, b_k, b_v, *,
                    compute_dtype=jnp.float32, tm=256, tn=256, tk=512):
    """x2d:(M,K); wt_*: pre-transposed (K,N); b_*: (1,N) -> three (M,N) f32."""
    M, K = x2d.shape
    N = wt_q.shape[1]
    tm, tn, tk = _pick_tile(M, tm), _pick_tile(N, tn), _pick_tile(K, tk)
    grid = (M // tm, N // tn, K // tk)

    x_spec = pl.BlockSpec((tm, tk), lambda i, j, k: (i, k))
    w_spec = pl.BlockSpec((tk, tn), lambda i, j, k: (k, j))
    b_spec = pl.BlockSpec((1, tn), lambda i, j, k: (0, j))
    o_spec = pl.BlockSpec((tm, tn), lambda i, j, k: (i, j))
    out_sds = jax.ShapeDtypeStruct((M, N), jnp.float32)

    return pl.pallas_call(
        _make_qkv_kernel(compute_dtype),
        out_shape=(out_sds, out_sds, out_sds),
        grid=grid,
        in_specs=[x_spec, w_spec, w_spec, w_spec, b_spec, b_spec, b_spec],
        out_specs=(o_spec, o_spec, o_spec),
        scratch_shapes=[pltpu.VMEM((tm, tn), jnp.float32),
                        pltpu.VMEM((tm, tn), jnp.float32),
                        pltpu.VMEM((tm, tn), jnp.float32)],
        compiler_params=pltpu.CompilerParams(
            dimension_semantics=("parallel", "parallel", "arbitrary")),
    )(x2d, wt_q, wt_k, wt_v, b_q, b_k, b_v)


# ------------------ attention + fused output-projection kernel --------------
def _make_attention_out_kernel(num_heads, head_dim, scale, compute_dtype):
    def kernel(q_ref, k_ref, v_ref, wo_ref, bo_ref, out_ref, w_ref, ctx_sc):
        # q_ref: (1, tq, D), k_ref/v_ref: (1, S, D), wo_ref: (D, D) pre-transposed,
        # bo_ref: (1, D), out_ref: (1, tq, D), w_ref: (1, H, tq, S),
        # ctx_sc: (tq, D) f32 VMEM scratch.  Heads are static slices of the lanes.
        for h in range(num_heads):
            lo = h * head_dim
            hi = lo + head_dim
            qh = q_ref[0, :, lo:hi].astype(compute_dtype)   # (tq, hd)
            kh = k_ref[0, :, lo:hi].astype(compute_dtype)   # (S,  hd)
            vh = v_ref[0, :, lo:hi].astype(compute_dtype)   # (S,  hd)

            # scores = (q @ k^T) / sqrt(hd) / temperature, without an explicit
            # K transpose: contract both head dims via dot_general.
            s = lax.dot_general(qh, kh, (((1,), (1,)), ((), ())),
                                preferred_element_type=jnp.float32) * scale

            # numerically-stable softmax in f32; reciprocal on the EUP slot.
            m = jnp.max(s, axis=-1, keepdims=True)
            e = jnp.exp(s - m)
            l = jnp.sum(e, axis=-1, keepdims=True)
            p = e * pl.reciprocal(l, approx=True)

            w_ref[0, h] = p                                  # (tq, S)
            ctx_sc[:, lo:hi] = jnp.dot(p.astype(compute_dtype), vh,
                                       preferred_element_type=jnp.float32)

        # fused out_proj: out = ctx @ W_out^T + b_out, straight from VMEM.
        out_ref[0] = (jnp.dot(ctx_sc[...].astype(compute_dtype),
                              wo_ref[...].astype(compute_dtype),
                              preferred_element_type=jnp.float32)
                      + bo_ref[...]).astype(out_ref.dtype)

    return kernel


def pallas_attention_out(q, k, v, wt_out, b_out, num_heads, scale, *,
                         compute_dtype=jnp.float32, tq_target=256):
    """q,k,v: (B,S,D); wt_out: (D,D) pre-transposed; b_out: (1,D).

    Returns (out (B,S,D), attn_weights (B,H,S,S))."""
    B, S, D = q.shape
    head_dim = D // num_heads
    tq = _pick_tile(S, tq_target)
    grid = (B, S // tq)

    q_spec = pl.BlockSpec((1, tq, D), lambda b, qi: (b, qi, 0))
    kv_spec = pl.BlockSpec((1, S, D), lambda b, qi: (b, 0, 0))   # resident per b
    wo_spec = pl.BlockSpec((D, D), lambda b, qi: (0, 0))         # resident always
    bo_spec = pl.BlockSpec((1, D), lambda b, qi: (0, 0))
    out_spec = pl.BlockSpec((1, tq, D), lambda b, qi: (b, qi, 0))
    w_spec = pl.BlockSpec((1, num_heads, tq, S), lambda b, qi: (b, 0, qi, 0))

    return pl.pallas_call(
        _make_attention_out_kernel(num_heads, head_dim, scale, compute_dtype),
        out_shape=(jax.ShapeDtypeStruct((B, S, D), jnp.float32),
                   jax.ShapeDtypeStruct((B, num_heads, S, S), jnp.float32)),
        grid=grid,
        in_specs=[q_spec, kv_spec, kv_spec, wo_spec, bo_spec],
        out_specs=(out_spec, w_spec),
        scratch_shapes=[pltpu.VMEM((tq, D), jnp.float32)],
        compiler_params=pltpu.CompilerParams(
            dimension_semantics=("parallel", "parallel")),
    )(q, k, v, wt_out, b_out)


# ------------------------------ full module ---------------------------------
def init_params(key, embed_dim):
    """Deterministic PyTorch-Linear-like init (uniform in +-1/sqrt(fan_in))."""
    bound = 1.0 / math.sqrt(embed_dim)
    keys = jax.random.split(key, 8)
    names = ["q", "k", "v", "out"]
    params = {}
    for i, n in enumerate(names):
        params[f"w_{n}"] = jax.random.uniform(
            keys[2 * i], (embed_dim, embed_dim), jnp.float32, -bound, bound)
        params[f"b_{n}"] = jax.random.uniform(
            keys[2 * i + 1], (embed_dim,), jnp.float32, -bound, bound)
    return params


def prepare_params(params):
    """One-time: pre-transpose weights (Din,Dout) and reshape biases to (1,Dout)."""
    prep = {}
    for n in ["q", "k", "v", "out"]:
        prep[f"wt_{n}"] = params[f"w_{n}"].T
        prep[f"b_{n}"] = params[f"b_{n}"].reshape(1, -1)
    return prep


def llm_style_attention(prepared, x, num_heads, temperature=1.0,
                        compute_dtype=jnp.float32):
    """Forward matching LLMStyleAttention.forward (eval mode, no top_k/top_p)."""
    B, S, D = x.shape
    hd = D // num_heads
    x2d = x.reshape(B * S, D)

    # Fused Q/K/V projection: x read once, three MXU dots per tile.
    q2d, k2d, v2d = pallas_qkv_proj(
        x2d, prepared["wt_q"], prepared["wt_k"], prepared["wt_v"],
        prepared["b_q"], prepared["b_k"], prepared["b_v"],
        compute_dtype=compute_dtype)

    # Stay in (B, S, D) layout; heads handled inside the attention kernel.
    q = q2d.reshape(B, S, D)
    k = k2d.reshape(B, S, D)
    v = v2d.reshape(B, S, D)

    scale = 1.0 / (math.sqrt(hd) * temperature)
    # Attention + fused out-projection (dropout(0.1) is identity in eval mode).
    out, attn_weights = pallas_attention_out(
        q, k, v, prepared["wt_out"], prepared["b_out"], num_heads, scale,
        compute_dtype=compute_dtype)
    return out, attn_weights


# -------------------------- pure-JAX reference ------------------------------
def reference_forward(params, x, num_heads, temperature=1.0):
    B, S, D = x.shape
    hd = D // num_heads

    def lin(t, w, b):
        return t @ w.T + b

    q = lin(x, params["w_q"], params["b_q"]).reshape(B, S, num_heads, hd)
    k = lin(x, params["w_k"], params["b_k"]).reshape(B, S, num_heads, hd)
    v = lin(x, params["w_v"], params["b_v"]).reshape(B, S, num_heads, hd)
    q, k, v = (t.transpose(0, 2, 1, 3) for t in (q, k, v))
    scores = jnp.einsum("bhqd,bhkd->bhqk", q, k) / math.sqrt(hd) / temperature
    attn = jax.nn.softmax(scores, axis=-1)
    ctx = jnp.einsum("bhqk,bhkd->bhqd", attn, v)
    ctx = ctx.transpose(0, 2, 1, 3).reshape(B, S, D)
    out = lin(ctx, params["w_out"], params["b_out"])
    return out, attn


# --------------------------------- main --------------------------------------
if __name__ == "__main__":
    B, S, D, H = 2, 8, 32, 4
    key = jax.random.PRNGKey(0)
    k_param, k_x = jax.random.split(key)

    params = init_params(k_param, D)
    prepared = prepare_params(params)
    x = jax.random.normal(k_x, (B, S, D), dtype=jnp.float32)

    fwd = jax.jit(functools.partial(llm_style_attention,
                                    num_heads=H, temperature=1.0))
    out, attn = fwd(prepared, x)
    out = jax.block_until_ready(out)
    attn = jax.block_until_ready(attn)

    assert out.shape == (B, S, D)
    assert attn.shape == (B, H, S, S)
    # attention rows must sum to 1 (approx reciprocal -> loose tolerance)
    assert bool(jnp.allclose(jnp.sum(attn, axis=-1), 1.0, atol=1e-2))

    # validate against a pure-JAX f32 reference of the PyTorch module
    ref_out, ref_attn = reference_forward(params, x, H, 1.0)
    assert bool(jnp.allclose(attn, ref_attn, atol=2e-2, rtol=2e-2))
    assert bool(jnp.allclose(out, ref_out, atol=2e-2, rtol=2e-2))

    print("KERNEL_OK")
</pallas_src>

<mosaic_0001>
module attributes {stable_mosaic.version = 11 : i64} {
  func.func @kernel(%arg0: i32, %arg1: i32, %arg2: memref<1x8x32xf32, #tpu.memory_space<vmem>>, %arg3: memref<1x8x32xf32, #tpu.memory_space<vmem>>, %arg4: memref<1x8x32xf32, #tpu.memory_space<vmem>>, %arg5: memref<32x32xf32, #tpu.memory_space<vmem>>, %arg6: memref<1x32xf32, #tpu.memory_space<vmem>>, %arg7: memref<1x8x32xf32, #tpu.memory_space<vmem>>, %arg8: memref<1x4x8x8xf32, #tpu.memory_space<vmem>>, %arg9: memref<8x32xf32, #tpu.memory_space<vmem>>) attributes {dimension_semantics = [#tpu.dimension_semantics<parallel>, #tpu.dimension_semantics<parallel>], iteration_bounds = array<i64: 2, 1>, scalar_prefetch = 0 : i64, scratch_operands = 1 : i64, tpu.core_type = #tpu.core_type<tc>, window_params = [{transform_indices = @transform_0, window_bounds = array<i64: 1, 8, 32>}, {transform_indices = @transform_1, window_bounds = array<i64: 1, 8, 32>}, {transform_indices = @transform_2, window_bounds = array<i64: 1, 8, 32>}, {pipeline_mode = #tpu.pipeline_mode<synchronous>, transform_indices = @transform_3, window_bounds = array<i64: 32, 32>}, {pipeline_mode = #tpu.pipeline_mode<synchronous>, transform_indices = @transform_4, window_bounds = array<i64: 1, 32>}, {transform_indices = @transform_5, window_bounds = array<i64: 1, 8, 32>}, {transform_indices = @transform_6, window_bounds = array<i64: 1, 4, 8, 8>}]} {
    %c0 = arith.constant 0 : index
    %c0_0 = arith.constant 0 : index
    %c0_1 = arith.constant 0 : index
    %0 = vector.load %arg2[%c0, %c0_0, %c0_1] : memref<1x8x32xf32, #tpu.memory_space<vmem>>, vector<1x8x8xf32>
    %1 = vector.shape_cast %0 : vector<1x8x8xf32> to vector<8x8xf32>
    %c0_2 = arith.constant 0 : index
    %c0_3 = arith.constant 0 : index
    %c0_4 = arith.constant 0 : index
    %2 = vector.load %arg3[%c0_2, %c0_3, %c0_4] : memref<1x8x32xf32, #tpu.memory_space<vmem>>, vector<1x8x8xf32>
    %3 = vector.shape_cast %2 : vector<1x8x8xf32> to vector<8x8xf32>
    %c0_5 = arith.constant 0 : index
    %c0_6 = arith.constant 0 : index
    %c0_7 = arith.constant 0 : index
    %4 = vector.load %arg4[%c0_5, %c0_6, %c0_7] : memref<1x8x32xf32, #tpu.memory_space<vmem>>, vector<1x8x8xf32>
    %5 = vector.shape_cast %4 : vector<1x8x8xf32> to vector<8x8xf32>
    %cst = arith.constant dense<0.000000e+00> : vector<8x8xf32>
    %6 = tpu.matmul %1, %3, %cst {dimension_numbers = #tpu.dot_dimension_numbers<[1], [1], [0], [0], [0, 0, 1, 0], [], []>} : vector<8x8xf32>, vector<8x8xf32>, vector<8x8xf32> -> vector<8x8xf32>
    %cst_8 = arith.constant 0.353553385 : f32
    %7 = vector.broadcast %cst_8 : f32 to vector<8x8xf32>
    %8 = arith.mulf %6, %7 : vector<8x8xf32>
    %cst_9 = arith.constant dense<0xFF800000> : vector<8xf32>
    %9 = vector.multi_reduction <maximumf>, %8, %cst_9 [1] : vector<8x8xf32> to vector<8xf32>
    %10 = vector.shape_cast %9 : vector<8xf32> to vector<8x1xf32>
    %11 = vector.broadcast %10 : vector<8x1xf32> to vector<8x8xf32>
    %12 = arith.subf %8, %11 : vector<8x8xf32>
    %13 = math.exp %12 : vector<8x8xf32>
    %cst_10 = arith.constant dense<0.000000e+00> : vector<8xf32>
    %14 = vector.multi_reduction <add>, %13, %cst_10 [1] : vector<8x8xf32> to vector<8xf32>
    %15 = vector.shape_cast %14 : vector<8xf32> to vector<8x1xf32>
    %16 = tpu.reciprocal %15 {approx = true} : vector<8x1xf32> -> vector<8x1xf32>
    %17 = vector.broadcast %16 : vector<8x1xf32> to vector<8x8xf32>
    %18 = arith.mulf %13, %17 : vector<8x8xf32>
    %c0_11 = arith.constant 0 : index
    %c0_12 = arith.constant 0 : index
    %c0_13 = arith.constant 0 : index
    %c0_14 = arith.constant 0 : index
    %19 = vector.load %arg8[%c0_11, %c0_12, %c0_13, %c0_14] : memref<1x4x8x8xf32, #tpu.memory_space<vmem>>, vector<1x1x8x8xf32>
    %20 = vector.shape_cast %19 : vector<1x1x8x8xf32> to vector<8x8xf32>
    %21 = vector.shape_cast %18 : vector<8x8xf32> to vector<1x1x8x8xf32>
    tpu.vector_store %arg8[%c0_11, %c0_12, %c0_13, %c0_14], %21 {strides = array<i32>} : memref<1x4x8x8xf32, #tpu.memory_space<vmem>>, vector<1x1x8x8xf32>,
    %cst_15 = arith.constant dense<0.000000e+00> : vector<8x8xf32>
    %22 = tpu.matmul %18, %5, %cst_15 {dimension_numbers = #tpu.dot_dimension_numbers<[1], [0], [0], [1], [0, 0, 1, 1], [], []>} : vector<8x8xf32>, vector<8x8xf32>, vector<8x8xf32> -> vector<8x8xf32>
    %c0_16 = arith.constant 0 : index
    %c0_17 = arith.constant 0 : index
    %23 = vector.load %arg9[%c0_16, %c0_17] : memref<8x32xf32, #tpu.memory_space<vmem>>, vector<8x8xf32>
    tpu.vector_store %arg9[%c0_16, %c0_17], %22 {strides = array<i32>} : memref<8x32xf32, #tpu.memory_space<vmem>>, vector<8x8xf32>,
    %c0_18 = arith.constant 0 : index
    %c0_19 = arith.constant 0 : index
    %c8 = arith.constant 8 : index
    %24 = vector.load %arg2[%c0_18, %c0_19, %c8] : memref<1x8x32xf32, #tpu.memory_space<vmem>>, vector<1x8x8xf32>
    %25 = vector.shape_cast %24 : vector<1x8x8xf32> to vector<8x8xf32>
    %c0_20 = arith.constant 0 : index
    %c0_21 = arith.constant 0 : index
    %c8_22 = arith.constant 8 : index
    %26 = vector.load %arg3[%c0_20, %c0_21, %c8_22] : memref<1x8x32xf32, #tpu.memory_space<vmem>>, vector<1x8x8xf32>
    %27 = vector.shape_cast %26 : vector<1x8x8xf32> to vector<8x8xf32>
    %c0_23 = arith.constant 0 : index
    %c0_24 = arith.constant 0 : index
    %c8_25 = arith.constant 8 : index
    %28 = vector.load %arg4[%c0_23, %c0_24, %c8_25] : memref<1x8x32xf32, #tpu.memory_space<vmem>>, vector<1x8x8xf32>
    %29 = vector.shape_cast %28 : vector<1x8x8xf32> to vector<8x8xf32>
    %cst_26 = arith.constant dense<0.000000e+00> : vector<8x8xf32>
    %30 = tpu.matmul %25, %27, %cst_26 {dimension_numbers = #tpu.dot_dimension_numbers<[1], [1], [0], [0], [0, 0, 1, 0], [], []>} : vector<8x8xf32>, vector<8x8xf32>, vector<8x8xf32> -> vector<8x8xf32>
    %cst_27 = arith.constant 0.353553385 : f32
    %31 = vector.broadcast %cst_27 : f32 to vector<8x8xf32>
    %32 = arith.mulf %30, %31 : vector<8x8xf32>
    %cst_28 = arith.constant dense<0xFF800000> : vector<8xf32>
    %33 = vector.multi_reduction <maximumf>, %32, %cst_28 [1] : vector<8x8xf32> to vector<8xf32>
    %34 = vector.shape_cast %33 : vector<8xf32> to vector<8x1xf32>
    %35 = vector.broadcast %34 : vector<8x1xf32> to vector<8x8xf32>
    %36 = arith.subf %32, %35 : vector<8x8xf32>
    %37 = math.exp %36 : vector<8x8xf32>
    %cst_29 = arith.constant dense<0.000000e+00> : vector<8xf32>
    %38 = vector.multi_reduction <add>, %37, %cst_29 [1] : vector<8x8xf32> to vector<8xf32>
    %39 = vector.shape_cast %38 : vector<8xf32> to vector<8x1xf32>
    %40 = tpu.reciprocal %39 {approx = true} : vector<8x1xf32> -> vector<8x1xf32>
    %41 = vector.broadcast %40 : vector<8x1xf32> to vector<8x8xf32>
    %42 = arith.mulf %37, %41 : vector<8x8xf32>
    %c0_30 = arith.constant 0 : index
    %c1 = arith.constant 1 : index
    %c0_31 = arith.constant 0 : index
    %c0_32 = arith.constant 0 : index
    %43 = vector.load %arg8[%c0_30, %c1, %c0_31, %c0_32] : memref<1x4x8x8xf32, #tpu.memory_space<vmem>>, vector<1x1x8x8xf32>
    %44 = vector.shape_cast %43 : vector<1x1x8x8xf32> to vector<8x8xf32>
    %45 = vector.shape_cast %42 : vector<8x8xf32> to vector<1x1x8x8xf32>
    tpu.vector_store %arg8[%c0_30, %c1, %c0_31, %c0_32], %45 {strides = array<i32>} : memref<1x4x8x8xf32, #tpu.memory_space<vmem>>, vector<1x1x8x8xf32>,
    %cst_33 = arith.constant dense<0.000000e+00> : vector<8x8xf32>
    %46 = tpu.matmul %42, %29, %cst_33 {dimension_numbers = #tpu.dot_dimension_numbers<[1], [0], [0], [1], [0, 0, 1, 1], [], []>} : vector<8x8xf32>, vector<8x8xf32>, vector<8x8xf32> -> vector<8x8xf32>
    %c0_34 = arith.constant 0 : index
    %c8_35 = arith.constant 8 : index
    %47 = vector.load %arg9[%c0_34, %c8_35] : memref<8x32xf32, #tpu.memory_space<vmem>>, vector<8x8xf32>
    tpu.vector_store %arg9[%c0_34, %c8_35], %46 {strides = array<i32>} : memref<8x32xf32, #tpu.memory_space<vmem>>, vector<8x8xf32>,
    %c0_36 = arith.constant 0 : index
    %c0_37 = arith.constant 0 : index
    %c16 = arith.constant 16 : index
    %48 = vector.load %arg2[%c0_36, %c0_37, %c16] : memref<1x8x32xf32, #tpu.memory_space<vmem>>, vector<1x8x8xf32>
    %49 = vector.shape_cast %48 : vector<1x8x8xf32> to vector<8x8xf32>
    %c0_38 = arith.constant 0 : index
    %c0_39 = arith.constant 0 : index
    %c16_40 = arith.constant 16 : index
    %50 = vector.load %arg3[%c0_38, %c0_39, %c16_40] : memref<1x8x32xf32, #tpu.memory_space<vmem>>, vector<1x8x8xf32>
    %51 = vector.shape_cast %50 : vector<1x8x8xf32> to vector<8x8xf32>
    %c0_41 = arith.constant 0 : index
    %c0_42 = arith.constant 0 : index
    %c16_43 = arith.constant 16 : index
    %52 = vector.load %arg4[%c0_41, %c0_42, %c16_43] : memref<1x8x32xf32, #tpu.memory_space<vmem>>, vector<1x8x8xf32>
    %53 = vector.shape_cast %52 : vector<1x8x8xf32> to vector<8x8xf32>
    %cst_44 = arith.constant dense<0.000000e+00> : vector<8x8xf32>
    %54 = tpu.matmul %49, %51, %cst_44 {dimension_numbers = #tpu.dot_dimension_numbers<[1], [1], [0], [0], [0, 0, 1, 0], [], []>} : vector<8x8xf32>, vector<8x8xf32>, vector<8x8xf32> -> vector<8x8xf32>
    %cst_45 = arith.constant 0.353553385 : f32
    %55 = vector.broadcast %cst_45 : f32 to vector<8x8xf32>
    %56 = arith.mulf %54, %55 : vector<8x8xf32>
    %cst_46 = arith.constant dense<0xFF800000> : vector<8xf32>
    %57 = vector.multi_reduction <maximumf>, %56, %cst_46 [1] : vector<8x8xf32> to vector<8xf32>
    %58 = vector.shape_cast %57 : vector<8xf32> to vector<8x1xf32>
    %59 = vector.broadcast %58 : vector<8x1xf32> to vector<8x8xf32>
    %60 = arith.subf %56, %59 : vector<8x8xf32>
    %61 = math.exp %60 : vector<8x8xf32>
    %cst_47 = arith.constant dense<0.000000e+00> : vector<8xf32>
    %62 = vector.multi_reduction <add>, %61, %cst_47 [1] : vector<8x8xf32> to vector<8xf32>
    %63 = vector.shape_cast %62 : vector<8xf32> to vector<8x1xf32>
    %64 = tpu.reciprocal %63 {approx = true} : vector<8x1xf32> -> vector<8x1xf32>
    %65 = vector.broadcast %64 : vector<8x1xf32> to vector<8x8xf32>
    %66 = arith.mulf %61, %65 : vector<8x8xf32>
    %c0_48 = arith.constant 0 : index
    %c2 = arith.constant 2 : index
    %c0_49 = arith.constant 0 : index
    %c0_50 = arith.constant 0 : index
    %67 = vector.load %arg8[%c0_48, %c2, %c0_49, %c0_50] : memref<1x4x8x8xf32, #tpu.memory_space<vmem>>, vector<1x1x8x8xf32>
    %68 = vector.shape_cast %67 : vector<1x1x8x8xf32> to vector<8x8xf32>
    %69 = vector.shape_cast %66 : vector<8x8xf32> to vector<1x1x8x8xf32>
    tpu.vector_store %arg8[%c0_48, %c2, %c0_49, %c0_50], %69 {strides = array<i32>} : memref<1x4x8x8xf32, #tpu.memory_space<vmem>>, vector<1x1x8x8xf32>,
    %cst_51 = arith.constant dense<0.000000e+00> : vector<8x8xf32>
    %70 = tpu.matmul %66, %53, %cst_51 {dimension_numbers = #tpu.dot_dimension_numbers<[1], [0], [0], [1], [0, 0, 1, 1], [], []>} : vector<8x8xf32>, vector<8x8xf32>, vector<8x8xf32> -> vector<8x8xf32>
    %c0_52 = arith.constant 0 : index
    %c16_53 = arith.constant 16 : index
    %71 = vector.load %arg9[%c0_52, %c16_53] : memref<8x32xf32, #tpu.memory_space<vmem>>, vector<8x8xf32>
    tpu.vector_store %arg9[%c0_52, %c16_53], %70 {strides = array<i32>} : memref<8x32xf32, #tpu.memory_space<vmem>>, vector<8x8xf32>,
    %c0_54 = arith.constant 0 : index
    %c0_55 = arith.constant 0 : index
    %c24 = arith.constant 24 : index
    %72 = vector.load %arg2[%c0_54, %c0_55, %c24] : memref<1x8x32xf32, #tpu.memory_space<vmem>>, vector<1x8x8xf32>
    %73 = vector.shape_cast %72 : vector<1x8x8xf32> to vector<8x8xf32>
    %c0_56 = arith.constant 0 : index
    %c0_57 = arith.constant 0 : index
    %c24_58 = arith.constant 24 : index
    %74 = vector.load %arg3[%c0_56, %c0_57, %c24_58] : memref<1x8x32xf32, #tpu.memory_space<vmem>>, vector<1x8x8xf32>
    %75 = vector.shape_cast %74 : vector<1x8x8xf32> to vector<8x8xf32>
    %c0_59 = arith.constant 0 : index
    %c0_60 = arith.constant 0 : index
    %c24_61 = arith.constant 24 : index
    %76 = vector.load %arg4[%c0_59, %c0_60, %c24_61] : memref<1x8x32xf32, #tpu.memory_space<vmem>>, vector<1x8x8xf32>
    %77 = vector.shape_cast %76 : vector<1x8x8xf32> to vector<8x8xf32>
    %cst_62 = arith.constant dense<0.000000e+00> : vector<8x8xf32>
    %78 = tpu.matmul %73, %75, %cst_62 {dimension_numbers = #tpu.dot_dimension_numbers<[1], [1], [0], [0], [0, 0, 1, 0], [], []>} : vector<8x8xf32>, vector<8x8xf32>, vector<8x8xf32> -> vector<8x8xf32>
    %cst_63 = arith.constant 0.353553385 : f32
    %79 = vector.broadcast %cst_63 : f32 to vector<8x8xf32>
    %80 = arith.mulf %78, %79 : vector<8x8xf32>
    %cst_64 = arith.constant dense<0xFF800000> : vector<8xf32>
    %81 = vector.multi_reduction <maximumf>, %80, %cst_64 [1] : vector<8x8xf32> to vector<8xf32>
    %82 = vector.shape_cast %81 : vector<8xf32> to vector<8x1xf32>
    %83 = vector.broadcast %82 : vector<8x1xf32> to vector<8x8xf32>
    %84 = arith.subf %80, %83 : vector<8x8xf32>
    %85 = math.exp %84 : vector<8x8xf32>
    %cst_65 = arith.constant dense<0.000000e+00> : vector<8xf32>
    %86 = vector.multi_reduction <add>, %85, %cst_65 [1] : vector<8x8xf32> to vector<8xf32>
    %87 = vector.shape_cast %86 : vector<8xf32> to vector<8x1xf32>
    %88 = tpu.reciprocal %87 {approx = true} : vector<8x1xf32> -> vector<8x1xf32>
    %89 = vector.broadcast %88 : vector<8x1xf32> to vector<8x8xf32>
    %90 = arith.mulf %85, %89 : vector<8x8xf32>
    %c0_66 = arith.constant 0 : index
    %c3 = arith.constant 3 : index
    %c0_67 = arith.constant 0 : index
    %c0_68 = arith.constant 0 : index
    %91 = vector.load %arg8[%c0_66, %c3, %c0_67, %c0_68] : memref<1x4x8x8xf32, #tpu.memory_space<vmem>>, vector<1x1x8x8xf32>
    %92 = vector.shape_cast %91 : vector<1x1x8x8xf32> to vector<8x8xf32>
    %93 = vector.shape_cast %90 : vector<8x8xf32> to vector<1x1x8x8xf32>
    tpu.vector_store %arg8[%c0_66, %c3, %c0_67, %c0_68], %93 {strides = array<i32>} : memref<1x4x8x8xf32, #tpu.memory_space<vmem>>, vector<1x1x8x8xf32>,
    %cst_69 = arith.constant dense<0.000000e+00> : vector<8x8xf32>
    %94 = tpu.matmul %90, %77, %cst_69 {dimension_numbers = #tpu.dot_dimension_numbers<[1], [0], [0], [1], [0, 0, 1, 1], [], []>} : vector<8x8xf32>, vector<8x8xf32>, vector<8x8xf32> -> vector<8x8xf32>
    %c0_70 = arith.constant 0 : index
    %c24_71 = arith.constant 24 : index
    %95 = vector.load %arg9[%c0_70, %c24_71] : memref<8x32xf32, #tpu.memory_space<vmem>>, vector<8x8xf32>
    tpu.vector_store %arg9[%c0_70, %c24_71], %94 {strides = array<i32>} : memref<8x32xf32, #tpu.memory_space<vmem>>, vector<8x8xf32>,
    %c0_72 = arith.constant 0 : index
    %c0_73 = arith.constant 0 : index
    %96 = vector.load %arg9[%c0_72, %c0_73] : memref<8x32xf32, #tpu.memory_space<vmem>>, vector<8x32xf32>
    %c0_74 = arith.constant 0 : index
    %c0_75 = arith.constant 0 : index
    %97 = vector.load %arg5[%c0_74, %c0_75] : memref<32x32xf32, #tpu.memory_space<vmem>>, vector<32x32xf32>
    %cst_76 = arith.constant dense<0.000000e+00> : vector<8x32xf32>
    %98 = tpu.matmul %96, %97, %cst_76 {dimension_numbers = #tpu.dot_dimension_numbers<[1], [0], [0], [1], [0, 0, 1, 1], [], []>} : vector<8x32xf32>, vector<32x32xf32>, vector<8x32xf32> -> vector<8x32xf32>
    %c0_77 = arith.constant 0 : index
    %c0_78 = arith.constant 0 : index
    %99 = vector.load %arg6[%c0_77, %c0_78] : memref<1x32xf32, #tpu.memory_space<vmem>>, vector<1x32xf32>
    %100 = vector.broadcast %99 : vector<1x32xf32> to vector<8x32xf32>
    %101 = arith.addf %98, %100 : vector<8x32xf32>
    %c0_79 = arith.constant 0 : index
    %c0_80 = arith.constant 0 : index
    %c0_81 = arith.constant 0 : index
    %102 = vector.load %arg7[%c0_79, %c0_80, %c0_81] : memref<1x8x32xf32, #tpu.memory_space<vmem>>, vector<1x8x32xf32>
    %103 = vector.shape_cast %102 : vector<1x8x32xf32> to vector<8x32xf32>
    %104 = vector.shape_cast %101 : vector<8x32xf32> to vector<1x8x32xf32>
    tpu.vector_store %arg7[%c0_79, %c0_80, %c0_81], %104 {strides = array<i32>} : memref<1x8x32xf32, #tpu.memory_space<vmem>>, vector<1x8x32xf32>,
    return
  }
  func.func @transform_0(%arg0: i32, %arg1: i32) -> (i32, i32, i32) {
    %c0_i32 = arith.constant 0 : i32
    %c0_i32_0 = arith.constant 0 : i32
    return %arg0, %arg1, %c0_i32 : i32, i32, i32
  }
  func.func @transform_1(%arg0: i32, %arg1: i32) -> (i32, i32, i32) {
    %c0_i32 = arith.constant 0 : i32
    %c0_i32_0 = arith.constant 0 : i32
    %c0_i32_1 = arith.constant 0 : i32
    return %arg0, %c0_i32, %c0_i32_0 : i32, i32, i32
  }
  func.func @transform_2(%arg0: i32, %arg1: i32) -> (i32, i32, i32) {
    %c0_i32 = arith.constant 0 : i32
    %c0_i32_0 = arith.constant 0 : i32
    %c0_i32_1 = arith.constant 0 : i32
    return %arg0, %c0_i32, %c0_i32_0 : i32, i32, i32
  }
  func.func @transform_3(%arg0: i32, %arg1: i32) -> (i32, i32) {
    %c0_i32 = arith.constant 0 : i32
    %c0_i32_0 = arith.constant 0 : i32
    %c0_i32_1 = arith.constant 0 : i32
    return %c0_i32, %c0_i32_0 : i32, i32
  }
  func.func @transform_4(%arg0: i32, %arg1: i32) -> (i32, i32) {
    %c0_i32 = arith.constant 0 : i32
    %c0_i32_0 = arith.constant 0 : i32
    %c0_i32_1 = arith.constant 0 : i32
    return %c0_i32, %c0_i32_0 : i32, i32
  }
  func.func @transform_5(%arg0: i32, %arg1: i32) -> (i32, i32, i32) {
    %c0_i32 = arith.constant 0 : i32
    %c0_i32_0 = arith.constant 0 : i32
    return %arg0, %arg1, %c0_i32 : i32, i32, i32
  }
  func.func @transform_6(%arg0: i32, %arg1: i32) -> (i32, i32, i32, i32) {
    %c0_i32 = arith.constant 0 : i32
    %c0_i32_0 = arith.constant 0 : i32
    %c0_i32_1 = arith.constant 0 : i32
    return %arg0, %c0_i32, %arg1, %c0_i32_0 : i32, i32, i32, i32
  }
}

module attributes {stable_mosaic.version = 11 : i64} {
  func.func @kernel(%arg0: i32, %arg1: i32, %arg2: i32, %arg3: memref<16x32xf32, #tpu.memory_space<vmem>>, %arg4: memref<32x32xf32, #tpu.memory_space<vmem>>, %arg5: memref<32x32xf32, #tpu.memory_space<vmem>>, %arg6: memref<32x32xf32, #tpu.memory_space<vmem>>, %arg7: memref<1x32xf32, #tpu.memory_space<vmem>>, %arg8: memref<1x32xf32, #tpu.memory_space<vmem>>, %arg9: memref<1x32xf32, #tpu.memory_space<vmem>>, %arg10: memref<16x32xf32, #tpu.memory_space<vmem>>, %arg11: memref<16x32xf32, #tpu.memory_space<vmem>>, %arg12: memref<16x32xf32, #tpu.memory_space<vmem>>, %arg13: memref<16x32xf32, #tpu.memory_space<vmem>>, %arg14: memref<16x32xf32, #tpu.memory_space<vmem>>, %arg15: memref<16x32xf32, #tpu.memory_space<vmem>>) attributes {dimension_semantics = [#tpu.dimension_semantics<parallel>, #tpu.dimension_semantics<parallel>, #tpu.dimension_semantics<arbitrary>], iteration_bounds = array<i64: 1, 1, 1>, scalar_prefetch = 0 : i64, scratch_operands = 3 : i64, tpu.core_type = #tpu.core_type<tc>, window_params = [{transform_indices = @transform_0, window_bounds = array<i64: 16, 32>}, {transform_indices = @transform_1, window_bounds = array<i64: 32, 32>}, {transform_indices = @transform_2, window_bounds = array<i64: 32, 32>}, {transform_indices = @transform_3, window_bounds = array<i64: 32, 32>}, {transform_indices = @transform_4, window_bounds = array<i64: 1, 32>}, {transform_indices = @transform_5, window_bounds = array<i64: 1, 32>}, {transform_indices = @transform_6, window_bounds = array<i64: 1, 32>}, {transform_indices = @transform_7, window_bounds = array<i64: 16, 32>}, {transform_indices = @transform_8, window_bounds = array<i64: 16, 32>}, {transform_indices = @transform_9, window_bounds = array<i64: 16, 32>}]} {
    %c0_i32 = arith.constant 0 : i32
    %0 = arith.cmpi eq, %arg2, %c0_i32 : i32
    %1 = arith.extui %0 : i1 to i32
    %c0_i32_0 = arith.constant 0 : i32
    %2 = arith.cmpi ne, %1, %c0_i32_0 : i32
    scf.if %2 {
      %cst_24 = arith.constant 0.000000e+00 : f32
      %22 = vector.broadcast %cst_24 : f32 to vector<16x32xf32>
      %c0_25 = arith.constant 0 : index
      %c0_26 = arith.constant 0 : index
      %23 = vector.load %arg13[%c0_25, %c0_26] : memref<16x32xf32, #tpu.memory_space<vmem>>, vector<16x32xf32>
      tpu.vector_store %arg13[%c0_25, %c0_26], %22 {strides = array<i32>} : memref<16x32xf32, #tpu.memory_space<vmem>>, vector<16x32xf32>,
      %cst_27 = arith.constant 0.000000e+00 : f32
      %24 = vector.broadcast %cst_27 : f32 to vector<16x32xf32>
      %c0_28 = arith.constant 0 : index
      %c0_29 = arith.constant 0 : index
      %25 = vector.load %arg14[%c0_28, %c0_29] : memref<16x32xf32, #tpu.memory_space<vmem>>, vector<16x32xf32>
      tpu.vector_store %arg14[%c0_28, %c0_29], %24 {strides = array<i32>} : memref<16x32xf32, #tpu.memory_space<vmem>>, vector<16x32xf32>,
      %cst_30 = arith.constant 0.000000e+00 : f32
      %26 = vector.broadcast %cst_30 : f32 to vector<16x32xf32>
      %c0_31 = arith.constant 0 : index
      %c0_32 = arith.constant 0 : index
      %27 = vector.load %arg15[%c0_31, %c0_32] : memref<16x32xf32, #tpu.memory_space<vmem>>, vector<16x32xf32>
      tpu.vector_store %arg15[%c0_31, %c0_32], %26 {strides = array<i32>} : memref<16x32xf32, #tpu.memory_space<vmem>>, vector<16x32xf32>,
    } else {
    }
    %c0 = arith.constant 0 : index
    %c0_1 = arith.constant 0 : index
    %3 = vector.load %arg3[%c0, %c0_1] : memref<16x32xf32, #tpu.memory_space<vmem>>, vector<16x32xf32>
    %c0_2 = arith.constant 0 : index
    %c0_3 = arith.constant 0 : index
    %4 = vector.load %arg13[%c0_2, %c0_3] : memref<16x32xf32, #tpu.memory_space<vmem>>, vector<16x32xf32>
    %c0_4 = arith.constant 0 : index
    %c0_5 = arith.constant 0 : index
    %5 = vector.load %arg4[%c0_4, %c0_5] : memref<32x32xf32, #tpu.memory_space<vmem>>, vector<32x32xf32>
    %cst = arith.constant dense<0.000000e+00> : vector<16x32xf32>
    %6 = tpu.matmul %3, %5, %cst {dimension_numbers = #tpu.dot_dimension_numbers<[1], [0], [0], [1], [0, 0, 1, 1], [], []>} : vector<16x32xf32>, vector<32x32xf32>, vector<16x32xf32> -> vector<16x32xf32>
    %7 = arith.addf %4, %6 : vector<16x32xf32>
    %c0_6 = arith.constant 0 : index
    %c0_7 = arith.constant 0 : index
    %8 = vector.load %arg13[%c0_6, %c0_7] : memref<16x32xf32, #tpu.memory_space<vmem>>, vector<16x32xf32>
    tpu.vector_store %arg13[%c0_6, %c0_7], %7 {strides = array<i32>} : memref<16x32xf32, #tpu.memory_space<vmem>>, vector<16x32xf32>,
    %c0_8 = arith.constant 0 : index
    %c0_9 = arith.constant 0 : index
    %9 = vector.load %arg14[%c0_8, %c0_9] : memref<16x32xf32, #tpu.memory_space<vmem>>, vector<16x32xf32>
    %c0_10 = arith.constant 0 : index
    %c0_11 = arith.constant 0 : index
    %10 = vector.load %arg5[%c0_10, %c0_11] : memref<32x32xf32, #tpu.memory_space<vmem>>, vector<32x32xf32>
    %cst_12 = arith.constant dense<0.000000e+00> : vector<16x32xf32>
    %11 = tpu.matmul %3, %10, %cst_12 {dimension_numbers = #tpu.dot_dimension_numbers<[1], [0], [0], [1], [0, 0, 1, 1], [], []>} : vector<16x32xf32>, vector<32x32xf32>, vector<16x32xf32> -> vector<16x32xf32>
    %12 = arith.addf %9, %11 : vector<16x32xf32>
    %c0_13 = arith.constant 0 : index
    %c0_14 = arith.constant 0 : index
    %13 = vector.load %arg14[%c0_13, %c0_14] : memref<16x32xf32, #tpu.memory_space<vmem>>, vector<16x32xf32>
    tpu.vector_store %arg14[%c0_13, %c0_14], %12 {strides = array<i32>} : memref<16x32xf32, #tpu.memory_space<vmem>>, vector<16x32xf32>,
    %c0_15 = arith.constant 0 : index
    %c0_16 = arith.constant 0 : index
    %14 = vector.load %arg15[%c0_15, %c0_16] : memref<16x32xf32, #tpu.memory_space<vmem>>, vector<16x32xf32>
    %c0_17 = arith.constant 0 : index
    %c0_18 = arith.constant 0 : index
    %15 = vector.load %arg6[%c0_17, %c0_18] : memref<32x32xf32, #tpu.memory_space<vmem>>, vector<32x32xf32>
    %cst_19 = arith.constant dense<0.000000e+00> : vector<16x32xf32>
    %16 = tpu.matmul %3, %15, %cst_19 {dimension_numbers = #tpu.dot_dimension_numbers<[1], [0], [0], [1], [0, 0, 1, 1], [], []>} : vector<16x32xf32>, vector<32x32xf32>, vector<16x32xf32> -> vector<16x32xf32>
    %17 = arith.addf %14, %16 : vector<16x32xf32>
    %c0_20 = arith.constant 0 : index
    %c0_21 = arith.constant 0 : index
    %18 = vector.load %arg15[%c0_20, %c0_21] : memref<16x32xf32, #tpu.memory_space<vmem>>, vector<16x32xf32>
    tpu.vector_store %arg15[%c0_20, %c0_21], %17 {strides = array<i32>} : memref<16x32xf32, #tpu.memory_space<vmem>>, vector<16x32xf32>,
    %c0_i32_22 = arith.constant 0 : i32
    %19 = arith.cmpi eq, %arg2, %c0_i32_22 : i32
    %20 = arith.extui %19 : i1 to i32
    %c0_i32_23 = arith.constant 0 : i32
    %21 = arith.cmpi ne, %20, %c0_i32_23 : i32
    scf.if %21 {
      %c0_24 = arith.constant 0 : index
      %c0_25 = arith.constant 0 : index
      %22 = vector.load %arg13[%c0_24, %c0_25] : memref<16x32xf32, #tpu.memory_space<vmem>>, vector<16x32xf32>
      %c0_26 = arith.constant 0 : index
      %c0_27 = arith.constant 0 : index
      %23 = vector.load %arg7[%c0_26, %c0_27] : memref<1x32xf32, #tpu.memory_space<vmem>>, vector<1x32xf32>
      %24 = vector.broadcast %23 : vector<1x32xf32> to vector<16x32xf32>
      %25 = arith.addf %22, %24 : vector<16x32xf32>
      %c0_28 = arith.constant 0 : index
      %c0_29 = arith.constant 0 : index
      %26 = vector.load %arg10[%c0_28, %c0_29] : memref<16x32xf32, #tpu.memory_space<vmem>>, vector<16x32xf32>
      tpu.vector_store %arg10[%c0_28, %c0_29], %25 {strides = array<i32>} : memref<16x32xf32, #tpu.memory_space<vmem>>, vector<16x32xf32>,
      %c0_30 = arith.constant 0 : index
      %c0_31 = arith.constant 0 : index
      %27 = vector.load %arg14[%c0_30, %c0_31] : memref<16x32xf32, #tpu.memory_space<vmem>>, vector<16x32xf32>
      %c0_32 = arith.constant 0 : index
      %c0_33 = arith.constant 0 : index
      %28 = vector.load %arg8[%c0_32, %c0_33] : memref<1x32xf32, #tpu.memory_space<vmem>>, vector<1x32xf32>
      %29 = vector.broadcast %28 : vector<1x32xf32> to vector<16x32xf32>
      %30 = arith.addf %27, %29 : vector<16x32xf32>
      %c0_34 = arith.constant 0 : index
      %c0_35 = arith.constant 0 : index
      %31 = vector.load %arg11[%c0_34, %c0_35] : memref<16x32xf32, #tpu.memory_space<vmem>>, vector<16x32xf32>
      tpu.vector_store %arg11[%c0_34, %c0_35], %30 {strides = array<i32>} : memref<16x32xf32, #tpu.memory_space<vmem>>, vector<16x32xf32>,
      %c0_36 = arith.constant 0 : index
      %c0_37 = arith.constant 0 : index
      %32 = vector.load %arg15[%c0_36, %c0_37] : memref<16x32xf32, #tpu.memory_space<vmem>>, vector<16x32xf32>
      %c0_38 = arith.constant 0 : index
      %c0_39 = arith.constant 0 : index
      %33 = vector.load %arg9[%c0_38, %c0_39] : memref<1x32xf32, #tpu.memory_space<vmem>>, vector<1x32xf32>
      %34 = vector.broadcast %33 : vector<1x32xf32> to vector<16x32xf32>
      %35 = arith.addf %32, %34 : vector<16x32xf32>
      %c0_40 = arith.constant 0 : index
      %c0_41 = arith.constant 0 : index
      %36 = vector.load %arg12[%c0_40, %c0_41] : memref<16x32xf32, #tpu.memory_space<vmem>>, vector<16x32xf32>
      tpu.vector_store %arg12[%c0_40, %c0_41], %35 {strides = array<i32>} : memref<16x32xf32, #tpu.memory_space<vmem>>, vector<16x32xf32>,
    } else {
    }
    return
  }
  func.func @transform_0(%arg0: i32, %arg1: i32, %arg2: i32) -> (i32, i32) {
    %c0_i32 = arith.constant 0 : i32
    return %arg0, %arg2 : i32, i32
  }
  func.func @transform_1(%arg0: i32, %arg1: i32, %arg2: i32) -> (i32, i32) {
    %c0_i32 = arith.constant 0 : i32
    return %arg2, %arg1 : i32, i32
  }
  func.func @transform_2(%arg0: i32, %arg1: i32, %arg2: i32) -> (i32, i32) {
    %c0_i32 = arith.constant 0 : i32
    return %arg2, %arg1 : i32, i32
  }
  func.func @transform_3(%arg0: i32, %arg1: i32, %arg2: i32) -> (i32, i32) {
    %c0_i32 = arith.constant 0 : i32
    return %arg2, %arg1 : i32, i32
  }
  func.func @transform_4(%arg0: i32, %arg1: i32, %arg2: i32) -> (i32, i32) {
    %c0_i32 = arith.constant 0 : i32
    %c0_i32_0 = arith.constant 0 : i32
    return %c0_i32, %arg1 : i32, i32
  }
  func.func @transform_5(%arg0: i32, %arg1: i32, %arg2: i32) -> (i32, i32) {
    %c0_i32 = arith.constant 0 : i32
    %c0_i32_0 = arith.constant 0 : i32
    return %c0_i32, %arg1 : i32, i32
  }
  func.func @transform_6(%arg0: i32, %arg1: i32, %arg2: i32) -> (i32, i32) {
    %c0_i32 = arith.constant 0 : i32
    %c0_i32_0 = arith.constant 0 : i32
    return %c0_i32, %arg1 : i32, i32
  }
  func.func @transform_7(%arg0: i32, %arg1: i32, %arg2: i32) -> (i32, i32) {
    %c0_i32 = arith.constant 0 : i32
    return %arg0, %arg1 : i32, i32
  }
  func.func @transform_8(%arg0: i32, %arg1: i32, %arg2: i32) -> (i32, i32) {
    %c0_i32 = arith.constant 0 : i32
    return %arg0, %arg1 : i32, i32
  }
  func.func @transform_9(%arg0: i32, %arg1: i32, %arg2: i32) -> (i32, i32) {
    %c0_i32 = arith.constant 0 : i32
    return %arg0, %arg1 : i32, i32
  }
}

</mosaic_0001>

<bundles_post_ra>
// kernel: llm_style_attention.3
= control target key start
LH: loop header
LB: loop body
LE: loop exit
PB: predicated region body
PF: predicated region fallthrough
CT: control target
= control target key end

     0   :  { %s1362_s0 = inlined_call_operand.vmem [shape: f32[2,8,32], index: 0, kind: input, shape index: {}]   ;;  %s1363_s1 = inlined_call_operand.vmem [shape: f32[2,8,32], index: 1, kind: input, shape index: {}]   ;;  %s1364_s2 = inlined_call_operand.vmem [shape: f32[2,8,32], index: 2, kind: input, shape index: {}]   ;;  %s1365_s3 = inlined_call_operand.hbm [shape: f32[32,32], index: 3, kind: input, shape index: {}]   ;;  %s1366_s4 = inlined_call_operand.vmem [shape: f32[1,32], index: 4, kind: input, shape index: {}]   ;;  %s1367_s5 = inlined_call_operand.hbm [shape: f32[2,8,32], index: 5, kind: output, shape index: {0}]   ;;  %s1368_s6 = inlined_call_operand.hbm [shape: f32[2,4,8,8], index: 6, kind: output, shape index: {1}]  }
   0x1   :  { %1370 = sst [smem:[#allocation12_spill]] %s1362_s0 }
   0x2   :  { %1371 = sst [smem:[#allocation13_spill]] %s1363_s1 }
   0x3   :  { %12 = vsyncpa [#allocation4], 0 }
   0x4   :  { %13 = vsyncpa [#allocation5], 0 }
   0x5   :  { %15 = vsyncpa [#allocation5 + $0x1], 0 }
   0x6   :  { %16 = vsyncpa [#allocation8], 0 }
   0x7   :  { %18 = vsyncpa [#allocation8 + $0x1], 0  ;;  %s1183_s21 = smov 0   ;;  %s1185_s22 = smov 0  }
   0x8   :  { %s1187_s23 = smov 0   ;;  %s1189_s24 = smov 0  }
   0x9   :  { %s1191_s25 = smov 0   ;;  %s1193_s26 = smov 0  }
   0xa LB: > { %s859_s27 = sadd.s32 4294967295, %s1136_s26   ;;  %s860_s28 = sadd.s32 4294967294, %s1136_s26   ;;  %s1136_s26 = sphi %s1193_s26, %s24_s26   ;;  %s1132_s25 = sphi %s1191_s25, %s1381_s25   ;;  %s1128_s24 = sphi %s1189_s24, %s1380_s24   ;;  %s1124_s23 = sphi %s1187_s23, %s1379_s23   ;;  %s1120_s22 = sphi %s1185_s22, %s1378_s22   ;;  %s1116_s21 = sphi %s1183_s21, %s1377_s21  }
   0xb   : > { %s36_s29 = sadd.s32 1, %s1132_s25  ;;  %s167_s30 = sadd.s32 1, %s1124_s23 }
   0xc   : > { %p38_p0 = scmp.ge.s32.totalorder %s36_s29, 2  ;;  %p177_p1 = scmp.ne.s32.totalorder %s1124_s23, %s1120_s22 }
   0xd   : > { %p178_p2 = scmp.eq.s32.totalorder %s859_s27, 1  ;;  %p183_p3 = scmp.ne.s32.totalorder %s1120_s22, %s1116_s21 }
   0xe   : > { %s1383_s29 = smov (%p38_p0, %s36_s29), 0  ;;  %p184_p5 = scmp.eq.s32.totalorder %s860_s28, 1 }
   0xf   : > { %p1223_p4 = por %p178_p2, %p177_p1  ;;  %s162_s8 = ssub.s32 %s1132_s25, %s1383_s29 }
  0x10   : > { %p861_p6 = scmp.ge.s32.totalorder %s1136_s26, 1  ;;  %p165_p7 = scmp.eq.s32.totalorder %s162_s8, 0 }
  0x11   : > { %p1230_p8 = por %p184_p5, %p183_p3  ;;  %p219_p9 = scmp.lt.s32.totalorder %s1136_s26, 3 }
  0x12   : > { %s1236_s10 = scalar_select %p165_p7, %s1124_s23, %s167_s30  }
  0x13   : > { %p220_p10 = pnand %p861_p6, %p219_p9  ;;  %p914_p11 = scmp.eq.s32.totalorder %s859_s27, 0 }
  0x14   : > { %s230_s13 = sshll.u32 %s1365_s3, 4  ;;  %s1138_s14 = smov [#allocation3]   ;;  %s231_s13 = int_to_ptr.hbm [resolvable:$true] %s230_s13 }
  0x15   : > { %p903_p12 = pneg %p220_p10  ;;  %s232_s15 = sshll.u32 %s1138_s14, 4  ;;  %s233_s15 = int_to_ptr.vmem [resolvable:$true] %s232_s15 }
  0x16   : > { %s1139_s16 = smov 128   ;;  %s1140_s17 = smov 8  }
  0x17   : > { %p904_p13 = pnand %p914_p11, %p903_p12  ;;  %275 = sbr.rel (%p220_p10) target bundleno = 1201 (0x4b1), region = 40 }
  0x19   : > { %906 = dma.hbm_to_vmem [thread:$0]  (!%p904_p13), %s231_s13, 512, %s233_s15, [#allocation4], %s1139_s16, %s1139_s16, %s1140_s17  }
  0x1c   : > { %1103 = dma.done.wait (%p914_p11), [#allocation4], 512  }
  0x1d   : > { %1105 = vsyncadd (%p914_p11), [#allocation4], 4294966784  ;;  %p321_p0 = scmp.lt.s32.totalorder %s1128_s24, 1  ;;  %s1374_s1 = sld [smem:[#allocation13_spill]]  ;;  %vm339_vm0 = vcmask 64512   ;;  %vm481_vm1 = vcmask 130112  }
  0x1e   : > { %s1375_s0 = sld [smem:[#allocation12_spill]]  ;;  %s1141_s12 = smov 120   ;;  %v647_v61 = vld [vmem:[#allocation3 + $0x18] sm:$0xff]  ;;  %v646_v62 = vld [vmem:[#allocation3 + $0x10] sm:$0xff]  ;;  %v645_v63 = vld [vmem:[#allocation3 + $0x8] sm:$0xff]  ;;  %vm561_vm2 = vcmask 195712  }
  0x1f   : > { %s322_s18 = scalar_select %p321_p0, %s1128_s24, 1  ;;  %vm641_vm3 = vcmask 261312   ;;  %vm652_vm4 = vcmask 261120  }
  0x20   : > { %s1142_s13 = smov 112   ;;  %s1143_s14 = smov 104  }
  0x21   : > { %s1243_s19 = sshll.u32 %s322_s18, 3  ;;  %s1276_s18 = sand.u32 1, %s1120_s22  }
  0x22   : > { %s335_s17 = scalar_lea.vmem %s1364_s2, %s1243_s19  ;;  %s1369_s27 = smov 8  }
  0x23   : > { %s331_s28 = scalar_lea.vmem %s1374_s1, %s1243_s19  ;;  %v338_v18 = vld [vmem:[%s335_s17] sm:$0xff]  ;;  %s1146_s30 = smov 16  }
  0x24   : > { %s327_s11 = scalar_lea.vmem %s1375_s0, %s1243_s19  ;;  %v337_v0 = vld [vmem:[%s331_s28] sm:$0xff]  ;;  %397 = vmatpush.msra.mxu1 %v338_v18  ;;  %s867_s19 = sshll.u32 %s1276_s18, 5 }
  0x25   : > { %871 = vmatpush.xpose.msk.msra.mxu0 %vm339_vm0, %v337_v0  ;;  %v336_v1 = vld [vmem:[%s327_s11] sm:$0xff]  ;;  %410 = vrot.lane.b32.xlu1 %v337_v0, %s1141_s12  ;;  %s1281_s20 = scalar_lea.vmem [#allocation7], %s867_s19  ;;  %s1145_s28 = smov 24  }
  0x26   : > { %490 = vrot.lane.b32.xlu2 %v337_v0, %s1142_s13  ;;  %s711_s8 = sshll.u32 %s1281_s20, 4  ;;  %s894_s11 = sshll.u32 %s1128_s24, 5  ;;  %s712_s8 = int_to_ptr.vmem [resolvable:$true] %s711_s8 }
  0x27   : > { %s683_s16 = scalar_lea.sflag [#allocation8], %s1276_s18 }
  0x28   : > { %872 = vmatmul.msk.f32.vlgmr.msra.gmra.mxu0 %vm339_vm0, %v336_v1 }
  0x2d   : > { %407 = vrot.lane.b32.xlu1 %v336_v1, %s1141_s12 }
  0x2e   : > { %570 = vrot.lane.b32.xlu2 %v337_v0, %s1143_s14  ;;  %v644_v0 = vld [vmem:[#allocation3] sm:$0xff] }
  0x35   : > { %567 = vrot.lane.b32.xlu1 %v336_v1, %s1143_s14 }
  0x80   : > { %v491_v2 = vpop.permute.xlu2 %490 }
  0x81   : > { %878 = vmatpush.xpose.msk.msrb.mxu1 %vm339_vm0, %v491_v2 }
  0x88   : > { %v571_v3 = vpop.permute.xlu2 %570 }
  0x89   : > { %882 = vmatpush.xpose.msk.msrb.mxu0 %vm339_vm0, %v571_v3 }
  0x97   : > { %v411_v4 = vpop.permute.xlu1 %410 }
  0x98   : > { %874 = vmatpush.xpose.msk.msra.mxu2 %vm339_vm0, %v411_v4 }
  0x9f   : > { %v408_v5 = vpop.permute.xlu1 %407 }
  0xa0   : > { %875 = vmatmul.msk.f32.vlgmr.msra.gmra.mxu2 %vm339_vm0, %v408_v5 }
  0xa5   : > { %v363_v6 = vpop.f32.mrf.mxu0 }
  0xa6   : > { %v366_v7 = vmul.f32 0.35355338, %v363_v6 }
  0xa7   : > { %v568_v8 = vpop.permute.xlu1 %567 }
  0xa8   : > { %v367_v9 = vsel %vm339_vm0, %v366_v7, -inf  ;;  %883 = vmatmul.msk.f32.vlgmr.msrb.gmra.mxu0 %vm339_vm0, %v568_v8 }
  0xa9   : > { %368 = vmax.xlane.f32.xlu0 %v367_v9 }
 0x11c   : > { %v369_v10 = vpop.xlane.xlu0 %368 }
 0x11d   : > { %v370_v11 = vsub.f32 %v366_v7, %v369_v10 }
 0x11f   : > { %v371_v12 = vmul.f32 1.442695, %v370_v11 }
 0x121   : > { %976 = vpow2.f32 %v371_v12 }
 0x123   : > { %v433_v13 = vpop.f32.mrf.mxu2 }
 0x124   : > { %v436_v14 = vmul.f32 0.35355338, %v433_v13 }
 0x125   : > { %v593_v19 = vpop.f32.mrf.mxu0 }
 0x126   : > { %v437_v15 = vsel %vm339_vm0, %v436_v14, -inf  ;;  %v596_v20 = vmul.f32 0.35355338, %v593_v19 }
 0x127   : > { %v977_v16 = vpop.eup %976  ;;  %438 = vmax.xlane.f32.xlu2 %v437_v15 }
 0x128   : > { %v373_v17 = vsel %vm339_vm0, %v977_v16, 0.0  ;;  %v597_v21 = vsel %vm339_vm0, %v596_v20, -inf }
 0x129   : > { %374 = vadd.xlane.f32.xlu0 %v373_v17 }
 0x13d   : > { %487 = vrot.lane.b32.xlu0 %v336_v1, %s1142_s13 }
 0x167   : > { %598 = vmax.xlane.f32.xlu0 %v597_v21 }
 0x17b   : > { %531 = vrot.lane.b32.xlu0 %v338_v18, %s1142_s13 }
 0x19a   : > { %v439_v22 = vpop.xlane.xlu2 %438 }
 0x19b   : > { %v440_v23 = vsub.f32 %v436_v14, %v439_v22 }
 0x19c   : > { %v375_v24 = vpop.xlane.xlu0 %374 }
 0x19d   : > { %978 = vrcp.f32 %v375_v24  ;;  %v441_v25 = vmul.f32 1.442695, %v440_v23 }
 0x19f   : > { %980 = vpow2.f32 %v441_v25 }
 0x1a3   : > { %v979_v26 = vpop.eup %978 }
 0x1a4   : > { %v377_v27 = vmul.f32 %v979_v26, %v977_v16 }
 0x1a5   : > { %v981_v28 = vpop.eup %980 }
 0x1a6   : > { %873 = vmatmul.msk.f32.vlgmr.msra.gmra.mxu1 %vm339_vm0, %v377_v27  ;;  %v443_v29 = vsel %vm339_vm0, %v981_v28, 0.0  ;;  %378 = vst.msk [vmem:[%s1281_s20] sm:$0xff] %vm339_vm0, %v377_v27 }
 0x1a7   : > { %444 = vadd.xlane.f32.xlu2 %v443_v29  ;;  %668 = vmatpush.msra.mxu1 %v647_v61 }
 0x1a9   : > { %669 = vmatpush.msra.mxu1 %v646_v62 }
 0x1ab   : > { %670 = vmatpush.msra.mxu1 %v645_v63 }
 0x1ad   : > { %671 = vmatpush.msra.mxu1 %v644_v0 }
 0x1af   : > { %v488_v30 = vpop.permute.xlu0 %487 }
 0x1b0   : > { %879 = vmatmul.msk.f32.vlgmr.msrb.gmra.mxu1 %vm339_vm0, %v488_v30 }
 0x1da   : > { %v599_v31 = vpop.xlane.xlu0 %598 }
 0x1db   : > { %v600_v32 = vsub.f32 %v596_v20, %v599_v31 }
 0x1dd   : > { %v601_v33 = vmul.f32 1.442695, %v600_v32 }
 0x1df   : > { %982 = vpow2.f32 %v601_v33 }
 0x1e5   : > { %v983_v34 = vpop.eup %982 }
 0x1e6   : > { %v603_v35 = vsel %vm339_vm0, %v983_v34, 0.0 }
 0x1e7   : > { %604 = vadd.xlane.f32.xlu2 %v603_v35 }
 0x1ed   : > { %v532_v52 = vpop.permute.xlu0 %531 }
 0x21a   : > { %v445_v36 = vpop.xlane.xlu2 %444 }
 0x21b   : > { %984 = vrcp.f32 %v445_v36 }
 0x221   : > { %v985_v37 = vpop.eup %984 }
 0x222   : > { %v447_v38 = vmul.f32 %v985_v37, %v981_v28 }
 0x223   : > { %v399_v39 = vpop.f32.mrf.mxu1 }
 0x224   : > { %402 = vst.msk [vmem:[#allocation2] sm:$0xff] %vm339_vm0, %v399_v39 }
 0x225   : > { %876 = vst.msk [vmem:[%s1281_s20 + $0x8] sm:$0xff] %vm339_vm0, %v447_v38 }
 0x22d   : > { %v513_v40 = vpop.f32.mrf.mxu1 }
 0x22e   : > { %v516_v41 = vmul.f32 0.35355338, %v513_v40 }
 0x230   : > { %v517_v42 = vsel %vm339_vm0, %v516_v41, -inf }
 0x231   : > { %518 = vmax.xlane.f32.xlu1 %v517_v42 }
 0x24a   : > { %451 = vrot.lane.b32.xlu1 %v338_v18, %s1141_s12 }
 0x25a   : > { %v605_v43 = vpop.xlane.xlu2 %604 }
 0x25b   : > { %986 = vrcp.f32 %v605_v43 }
 0x261   : > { %v987_v44 = vpop.eup %986 }
 0x262   : > { %v607_v45 = vmul.f32 %v987_v44, %v983_v34 }
 0x264   : > { %884 = vst.msk [vmem:[%s1281_s20 + $0x18] sm:$0xff] %vm339_vm0, %v607_v45 }
 0x2a4   : > { %v519_v46 = vpop.xlane.xlu1 %518 }
 0x2a5   : > { %v520_v47 = vsub.f32 %v516_v41, %v519_v46 }
 0x2a7   : > { %v521_v48 = vmul.f32 1.442695, %v520_v47 }
 0x2a9   : > { %988 = vpow2.f32 %v521_v48 }
 0x2af   : > { %v989_v49 = vpop.eup %988 }
 0x2b0   : > { %v523_v50 = vsel %vm339_vm0, %v989_v49, 0.0 }
 0x2b1   : > { %524 = vadd.xlane.f32.xlu2 %v523_v50 }
 0x2bc   : > { %v452_v51 = vpop.permute.xlu1 %451 }
 0x2bd   : > { %472 = vmatpush.msra.mxu3 %v452_v51 }
 0x2be   : > { %877 = vmatmul.msk.f32.vlgmr.msra.gmra.mxu3 %vm339_vm0, %v447_v38 }
 0x2bf   : > { %552 = vmatpush.msrb.mxu3 %v532_v52 }
 0x2c9   : > { %611 = vrot.lane.b32.xlu2 %v338_v18, %s1143_s14  ;;  %s710_s14 = scalar_lea.hbm %s1368_s6, %s894_s11 }
 0x2ca   : > { %s713_s15 = sshll.u32 %s710_s14, 4  ;;  %s714_s15 = int_to_ptr.hbm [resolvable:$true] %s713_s15 }
 0x2cb   : > { %s1036_s17 = sshra.s32 %s714_s15, 4  ;;  %s1037_s17 = int_to_ptr.hbm [resolvable:$true] %s1036_s17 }
 0x2cc   : > { %s1038_s19 = scalar_lea.hbm %s1037_s17, 32  ;;  %p1043_p5 = scmp.lt.s32.totalorder %s1037_s17, %s1368_s6 }
 0x2cd   : > { %p1039_p1 = scmp.ne.s32.totalorder %s1037_s17, %s1038_s19 }
 0x2cf   : > { %p1040_p2 = pnand %p1039_p1, %p1223_p4 }
 0x2d1   : > { %p1041_p3 = pneg %p1040_p2 }
 0x324   : > { %v525_v53 = vpop.xlane.xlu2 %524 }
 0x325   : > { %990 = vrcp.f32 %v525_v53 }
 0x32b   : > { %v991_v54 = vpop.eup %990 }
 0x32c   : > { %v612_v55 = vpop.permute.xlu2 %611  ;;  %v527_v56 = vmul.f32 %v991_v54, %v989_v49 }
 0x32d   : > { %632 = vmatpush.msrb.mxu2 %v612_v55 }
 0x32e   : > { %881 = vmatmul.msk.f32.vlgmr.msrb.gmra.mxu3 %vm339_vm0, %v527_v56  ;;  %885 = vmatmul.msk.f32.vlgmr.msrb.gmra.mxu2 %vm339_vm0, %v607_v45  ;;  %880 = vst.msk [vmem:[%s1281_s20 + $0x10] sm:$0xff] %vm339_vm0, %v527_v56  ;;  %s1042_s20 = scalar_lea.hbm %s1368_s6, 64 }
 0x32f   : > { %p1044_p6 = scmp.lt.s32.totalorder %s1042_s20, %s1038_s19 }
 0x331   : > { %p1045_p7 = por %p1044_p6, %p1043_p5 }
 0x333   : > { %p1046_p9 = pnand %p1045_p7, %p1041_p3 }
 0x341   : > { %v474_v57 = vpop.f32.mrf.mxu3 }
 0x342   : > { %478 = vrot.lane.b32.xlu1 %v474_v57, %s1369_s27 }
 0x3b1   : > { %v554_v58 = vpop.f32.mrf.mxu3  ;;  %v634_v59 = vpop.f32.mrf.mxu2 }
 0x3b2   : > { %638 = vrot.lane.b32.xlu1 %v634_v59, %s1145_s28  ;;  %558 = vrot.lane.b32.xlu0 %v554_v58, %s1146_s30 }
 0x3b4   : > { %v479_v60 = vpop.permute.xlu1 %478 }
 0x3b5   : > { %482 = vst.msk [vmem:[#allocation2] sm:$0xff] %vm481_vm1, %v479_v60 }
 0x424   : > { %v639_v1 = vpop.permute.xlu1 %638  ;;  %v559_v2 = vpop.permute.xlu0 %558 }
 0x425   : > { %562 = vst.msk [vmem:[#allocation2] sm:$0xff] %vm561_vm2, %v559_v2 }
 0x426   : > { %642 = vst.msk [vmem:[#allocation2] sm:$0xff] %vm641_vm3, %v639_v1 }
 0x42d   : > { %v643_v3 = vld [vmem:[#allocation2] sm:$0xff] }
 0x42e   : > { %886 = vmatmul.msk.f32.vlgmr.msra.gmra.mxu1 %vm652_vm4, %v643_v3 }
 0x42f   : > { %1049 = shalt.err (!%p1046_p9)
}
 0x430   : > { %s1147_s11 = smov 128   ;;  %s1376_s12 = smov 8   ;;  %v975_v4 = vld [vmem:[%s1366_s4] ss:$0 sm:$0xff] }
 0x431   : > { %900 = dma.vmem_to_hbm [thread:$0]  (%p1223_p4), %s712_s8, 512, %s714_s15, %s683_s16, %s1147_s11, %s1147_s11, %s1376_s12  }
 0x432   : > { %s866_s13 = sshll.u32 %s1276_s18, 3  ;;  %s889_s14 = sshll.u32 %s1128_s24, 3 }
 0x433   : > { %s694_s0 = scalar_lea.hbm %s1367_s5, %s889_s14  ;;  %s313_s19 = scalar_lea.vmem [#allocation6], %s866_s13 }
 0x434   : > { %s696_s20 = sshll.u32 %s313_s19, 4  ;;  %s698_s1 = sshll.u32 %s694_s0, 4  ;;  %s697_s20 = int_to_ptr.vmem [resolvable:$true] %s696_s20  ;;  %s699_s1 = int_to_ptr.hbm [resolvable:$true] %s698_s1 }
 0x435   : > { %s678_s8 = scalar_lea.sflag [#allocation5], %s1276_s18  ;;  %s1064_s24 = sshra.s32 %s699_s1, 4  ;;  %s1065_s24 = int_to_ptr.hbm [resolvable:$true] %s1064_s24 }
 0x436   : > { %s1066_s15 = scalar_lea.hbm %s1065_s24, 8  ;;  %s1070_s12 = scalar_lea.hbm %s1367_s5, 16 }
 0x437   : > { %p1067_p10 = scmp.ne.s32.totalorder %s1065_s24, %s1066_s15  ;;  %p1071_p13 = scmp.lt.s32.totalorder %s1065_s24, %s1367_s5 }
 0x438   : > { %p1072_p0 = scmp.lt.s32.totalorder %s1070_s12, %s1066_s15 }
 0x439   : > { %p1068_p11 = pnand %p1067_p10, %p1223_p4 }
 0x43a   : > { %p1073_p1 = por %p1072_p0, %p1071_p13 }
 0x43b   : > { %p1069_p12 = pneg %p1068_p11 }
 0x43d   : > { %p1074_p2 = pnand %p1073_p1, %p1069_p12 }
 0x4ab   : > { %v673_v5 = vpop.f32.mrf.mxu1 }
 0x4ac   : > { %v674_v6 = vadd.f32 %v975_v4, %v673_v5 }
 0x4ae   : > { %676 = vst.msk [vmem:[%s313_s19] sm:$0xff] %vm652_vm4, %v674_v6 }
 0x4af   : > { %1077 = shalt.err (!%p1074_p2)
}
 0x4b0   : > { %899 = dma.vmem_to_hbm [thread:$0]  (%p1223_p4), %s697_s20, 128, %s699_s1, %s678_s8  }
 0x4b1 PF: > { %p916_p3 = scmp.ge.s32.totalorder %s1136_s26, 2  ;;  %s728_s18 = sand.u32 1, %s1116_s21  }
 0x4b2   : > { %s729_s28 = scalar_lea.sflag [#allocation5], %s728_s18 }
 0x4b3   : > { %p908_p5 = pnand %p916_p3, %p1230_p8 }
 0x4b5   : > { %p909_p6 = pneg %p908_p5 }
 0x4b7   : > { %1107 = dma.done.wait (%p909_p6), %s729_s28, 128  }
 0x4b8   : > { %1109 = vsyncadd (%p909_p6), %s729_s28, 4294967168  ;;  %s739_s30 = scalar_lea.sflag [#allocation8], %s728_s18 }
 0x4b9   : > { %1111 = dma.done.wait (%p909_p6), %s739_s30, 512  }
 0x4ba   : > { %1113 = vsyncadd (%p909_p6), %s739_s30, 4294966784  ;;  %s24_s26 = sadd.s32 1, %s1136_s26   ;;  %s1377_s21 = smov %s1120_s22 }
 0x4bb   : > { %p21_p7 = scmp.ge.s32.totalorder %s24_s26, 4   ;;  %s1378_s22 = smov %s1124_s23 }
 0x4bc   : > { %s1379_s23 = smov %s1236_s10  ;;  %s1380_s24 = smov %s1132_s25 }
 0x4bd   : > { %s1381_s25 = smov %s1383_s29  ;;  %23 = sbr.rel (!%p21_p7) target bundleno = 10 (0xa), region = 106 }
 0x4c2   :  { %745 = vsyncpa [#allocation4], 1 }
 0x4c3   :  { %747 = vsyncpa [#allocation4 + $0x1], 1 }
 0x4c4   :  { %748 = vsyncpa [#allocation5], 1 }
 0x4c5   :  { %750 = vsyncpa [#allocation5 + $0x1], 1 }
 0x4c6   :  { %751 = vsyncpa [#allocation8], 1 }
 0x4c7   :  { %753 = vsyncpa [#allocation8 + $0x1], 1 }

// kernel: llm_style_attention.2
= control target key start
LH: loop header
LB: loop body
LE: loop exit
PB: predicated region body
PF: predicated region fallthrough
CT: control target
= control target key end

     0   :  { %15 = vsyncpa [#allocation6], 0  ;;  %s540_s0 = inlined_call_operand.hbm [shape: f32[16,32], index: 0, kind: input, shape index: {}]   ;;  %s541_s1 = inlined_call_operand.hbm [shape: f32[32,32], index: 1, kind: input, shape index: {}]   ;;  %s542_s2 = inlined_call_operand.hbm [shape: f32[32,32], index: 2, kind: input, shape index: {}]   ;;  %s543_s3 = inlined_call_operand.hbm [shape: f32[32,32], index: 3, kind: input, shape index: {}]   ;;  %s544_s4 = inlined_call_operand.vmem [shape: f32[1,32], index: 4, kind: input, shape index: {}]   ;;  %s545_s5 = inlined_call_operand.hbm [shape: f32[1,32], index: 5, kind: input, shape index: {}]   ;;  %s546_s6 = inlined_call_operand.vmem [shape: f32[1,32], index: 6, kind: input, shape index: {}]   ;;  %s547_s7 = inlined_call_operand.vmem [shape: f32[16,32], index: 7, kind: output, shape index: {0}]   ;;  %s548_s8 = inlined_call_operand.vmem [shape: f32[16,32], index: 8, kind: output, shape index: {1}]   ;;  %s549_s9 = inlined_call_operand.vmem [shape: f32[16,32], index: 9, kind: output, shape index: {2}]  }
   0x1   :  { %16 = vsyncpa [#allocation8], 0 }
   0x2   :  { %17 = vsyncpa [#allocation11], 0  ;;  %s35_s11 = sshll.u32 %s541_s1, 4  ;;  %s419_s12 = smov [#allocation7]   ;;  %s36_s11 = int_to_ptr.hbm [resolvable:$true] %s35_s11 }
   0x3   :  { %s37_s13 = sshll.u32 %s419_s12, 4  ;;  %s61_s16 = sshll.u32 %s543_s3, 4  ;;  %s38_s13 = int_to_ptr.vmem [resolvable:$true] %s37_s13  ;;  %s62_s16 = int_to_ptr.hbm [resolvable:$true] %s61_s16 }
   0x4   :  { %s420_s17 = smov 128   ;;  %s421_s18 = smov 8  }
   0x5   :  { %43 = dma.hbm_to_vmem [thread:$0]  %s36_s11, 512, %s38_s13, [#allocation8], %s420_s17, %s420_s17, %s421_s18  }
   0x6   :  { %s422_s19 = smov [#allocation10]   ;;  %s22_s23 = sshll.u32 %s540_s0, 4  ;;  %s23_s23 = int_to_ptr.hbm [resolvable:$true] %s22_s23 }
   0x7   :  { %s63_s20 = sshll.u32 %s422_s19, 4  ;;  %s48_s25 = sshll.u32 %s542_s2, 4  ;;  %s64_s20 = int_to_ptr.vmem [resolvable:$true] %s63_s20  ;;  %s49_s25 = int_to_ptr.hbm [resolvable:$true] %s48_s25 }
   0x8   :  { %69 = dma.hbm_to_vmem [thread:$0]  %s62_s16, 512, %s64_s20, [#allocation11], %s420_s17, %s420_s17, %s421_s18  }
   0x9   :  { %s423_s26 = smov [#allocation5]   ;;  %s424_s3 = smov [#allocation9]  }
   0xa   :  { %s24_s27 = sshll.u32 %s423_s26, 4  ;;  %s50_s28 = sshll.u32 %s424_s3, 4  ;;  %s25_s27 = int_to_ptr.vmem [resolvable:$true] %s24_s27  ;;  %s51_s28 = int_to_ptr.vmem [resolvable:$true] %s50_s28 }
   0xb   :  { %30 = dma.hbm_to_vmem [thread:$0]  %s23_s23, 256, %s25_s27, [#allocation6], %s420_s17, %s420_s17, %s421_s18  }
   0xc   :  { %s77_s10 = sshll.u32 %s545_s5, 4  ;;  %s425_s0 = smov [#allocation12]   ;;  %s78_s10 = int_to_ptr.hbm [resolvable:$true] %s77_s10 }
   0xd   :  { %56 = dma.hbm_to_vmem [thread:$0]  %s49_s25, 512, %s51_s28, [#allocation8], %s420_s17, %s420_s17, %s421_s18  }
   0xe   :  { %s79_s11 = sshll.u32 %s425_s0, 4  ;;  %s80_s11 = int_to_ptr.vmem [resolvable:$true] %s79_s11 }
   0xf   :  { %82 = dma.hbm_to_vmem [thread:$0]  %s78_s10, 16, %s80_s11, [#allocation11]  }
  0x10   :  { %413 = dma.done.wait [#allocation6], 256  }
  0x11   :  { %414 = vsyncadd [#allocation6], 4294967040 }
  0x12   :  { %415 = dma.done.wait [#allocation8], 1024  }
  0x13   :  { %416 = vsyncadd [#allocation8], 4294966272 }
  0x14   :  { %417 = dma.done.wait [#allocation11], 528  }
  0x15   :  { %418 = vsyncadd [#allocation11], 4294966768  ;;  %vm109_vm0 = vcmask 261120   ;;  %v426_v0 = vmov 0.0   ;;  %v196_v1 = vld [vmem:[#allocation10 + $0x18] sm:$0xff]  ;;  %v195_v2 = vld [vmem:[#allocation10 + $0x10] sm:$0xff] }
  0x16   :  { %112 = vst.msk [vmem:[#allocation3] sm:$0xff] %vm109_vm0, %v426_v0  ;;  %209 = vmatpush.msra.mxu2 %v196_v1  ;;  %v194_v3 = vld [vmem:[#allocation10 + $0x8] sm:$0xff]  ;;  %v163_v4 = vld [vmem:[#allocation9 + $0x18] sm:$0xff]  ;;  %v162_v6 = vld [vmem:[#allocation9 + $0x10] sm:$0xff] }
  0x17   :  { %110 = vst.msk [vmem:[#allocation2] sm:$0xff] %vm109_vm0, %v426_v0  ;;  %176 = vmatpush.msra.mxu1 %v163_v4  ;;  %v123_v5 = vld [vmem:[#allocation7 + $0x18] sm:$0xff]  ;;  %v122_v7 = vld [vmem:[#allocation7 + $0x10] sm:$0xff]  ;;  %v193_v8 = vld [vmem:[#allocation10] sm:$0xff] }
  0x18   :  { %111 = vst.msk [vmem:[#allocation2 + $0x8] sm:$0xff] %vm109_vm0, %v426_v0  ;;  %210 = vmatpush.msra.mxu2 %v195_v2  ;;  %278 = vmatpush.msra.mxu3 %v123_v5  ;;  %v161_v9 = vld [vmem:[#allocation9 + $0x8] sm:$0xff]  ;;  %v116_v10 = vld [vmem:[#allocation5] sm:$0xff]  ;;  %v160_v12 = vld [vmem:[#allocation9] sm:$0xff] }
  0x19   :  { %113 = vst.msk [vmem:[#allocation3 + $0x8] sm:$0xff] %vm109_vm0, %v426_v0  ;;  %177 = vmatpush.msra.mxu1 %v162_v6  ;;  %v121_v11 = vld [vmem:[#allocation7 + $0x8] sm:$0xff]  ;;  %143 = vmatpush.msra.mxu0 %v123_v5  ;;  %v120_v13 = vld [vmem:[#allocation7] sm:$0xff]  ;;  %v117_v14 = vld [vmem:[#allocation5 + $0x8] sm:$0xff] }
  0x1a   :  { %114 = vst.msk [vmem:[#allocation4] sm:$0xff] %vm109_vm0, %v426_v0  ;;  %211 = vmatpush.msra.mxu2 %v194_v3  ;;  %279 = vmatpush.msra.mxu3 %v122_v7  ;;  %v290_v26 = vld [vmem:[#allocation12] ss:$0 sm:$0xff] }
  0x1b   :  { %115 = vst.msk [vmem:[#allocation4 + $0x8] sm:$0xff] %vm109_vm0, %v426_v0  ;;  %178 = vmatpush.msra.mxu1 %v161_v9  ;;  %144 = vmatpush.msra.mxu0 %v122_v7  ;;  %v292_v33 = vld [vmem:[%s544_s4] ss:$0 sm:$0xff] }
  0x1c   :  { %212 = vmatpush.msra.mxu2 %v193_v8  ;;  %280 = vmatpush.msra.mxu3 %v121_v11  ;;  %v291_v35 = vld [vmem:[%s546_s6] ss:$0 sm:$0xff] }
  0x1d   :  { %276 = vmatmul.msk.f32.vlgmr.msra.gmra.mxu2 %vm109_vm0, %v116_v10  ;;  %179 = vmatpush.msra.mxu1 %v160_v12  ;;  %v158_v15 = vld [vmem:[#allocation3] sm:$0xff] }
  0x1e   :  { %274 = vmatmul.msk.f32.vlgmr.msra.gmra.mxu1 %vm109_vm0, %v116_v10  ;;  %281 = vmatpush.msra.mxu3 %v120_v13  ;;  %v118_v18 = vld [vmem:[#allocation2] sm:$0xff] }
  0x1f   :  { %273 = vmatmul.msk.f32.vlgmr.msra.gmra.mxu3 %vm109_vm0, %v117_v14  ;;  %145 = vmatpush.msra.mxu0 %v121_v11  ;;  %v119_v23 = vld [vmem:[#allocation2 + $0x8] sm:$0xff] }
  0x20   :  { %v159_v25 = vld [vmem:[#allocation3 + $0x8] sm:$0xff] }
  0x21   :  { %146 = vmatpush.msra.mxu0 %v120_v13  ;;  %v191_v19 = vld [vmem:[#allocation4] sm:$0xff] }
  0x22   :  { %272 = vmatmul.msk.f32.vlgmr.msra.gmra.mxu0 %vm109_vm0, %v116_v10  ;;  %v192_v34 = vld [vmem:[#allocation4 + $0x8] sm:$0xff] }
  0x25   :  { %277 = vmatmul.msk.f32.gmra.mxu2 %vm109_vm0, %v117_v14 }
  0x26   :  { %275 = vmatmul.msk.f32.gmra.mxu1 %vm109_vm0, %v117_v14 }
  0x9b   :  { %v181_v16 = vpop.f32.mrf.mxu1 }
  0x9c   :  { %v187_v17 = vadd.f32 %v181_v16, %v158_v15 }
  0x9e   :  { %189 = vst.msk [vmem:[#allocation3] sm:$0xff] %vm109_vm0, %v187_v17 }
  0x9f   :  { %v148_v20 = vpop.f32.mrf.mxu0 }
  0xa0   :  { %v214_v21 = vpop.f32.mrf.mxu2  ;;  %v154_v22 = vadd.f32 %v148_v20, %v118_v18 }
  0xa1   :  { %v220_v24 = vadd.f32 %v214_v21, %v191_v19 }
  0xa2   :  { %156 = vst.msk [vmem:[#allocation2] sm:$0xff] %vm109_vm0, %v154_v22  ;;  %v151_v27 = vpop.f32.mrf.mxu3 }
  0xa3   :  { %222 = vst.msk [vmem:[#allocation4] sm:$0xff] %vm109_vm0, %v220_v24  ;;  %v155_v28 = vadd.f32 %v151_v27, %v119_v23  ;;  %v184_v29 = vpop.f32.mrf.mxu1 }
  0xa4   :  { %v188_v30 = vadd.f32 %v184_v29, %v159_v25 }
  0xa5   :  { %v237_v31 = vld [vmem:[#allocation3] sm:$0xff]  ;;  %157 = vst.msk [vmem:[#allocation2 + $0x8] sm:$0xff] %vm109_vm0, %v155_v28 }
  0xa6   :  { %v243_v32 = vadd.f32 %v290_v26, %v237_v31  ;;  %190 = vst.msk [vmem:[#allocation3 + $0x8] sm:$0xff] %vm109_vm0, %v188_v30 }
  0xa8   :  { %245 = vst.msk [vmem:[%s548_s8] sm:$0xff] %vm109_vm0, %v243_v32  ;;  %v217_v36 = vpop.f32.mrf.mxu2 }
  0xa9   :  { %v227_v37 = vld [vmem:[#allocation2] sm:$0xff]  ;;  %v221_v38 = vadd.f32 %v217_v36, %v192_v34 }
  0xaa   :  { %v247_v39 = vld [vmem:[#allocation4] sm:$0xff]  ;;  %v233_v40 = vadd.f32 %v292_v33, %v227_v37 }
  0xab   :  { %v253_v41 = vadd.f32 %v291_v35, %v247_v39  ;;  %223 = vst.msk [vmem:[#allocation4 + $0x8] sm:$0xff] %vm109_vm0, %v221_v38 }
  0xac   :  { %235 = vst.msk [vmem:[%s547_s7] sm:$0xff] %vm109_vm0, %v233_v40  ;;  %v228_v42 = vld [vmem:[#allocation2 + $0x8] sm:$0xff] }
  0xad   :  { %255 = vst.msk [vmem:[%s549_s9] sm:$0xff] %vm109_vm0, %v253_v41  ;;  %v234_v43 = vadd.f32 %v292_v33, %v228_v42  ;;  %v238_v44 = vld [vmem:[#allocation3 + $0x8] sm:$0xff] }
  0xae   :  { %v244_v45 = vadd.f32 %v290_v26, %v238_v44 }
  0xaf   :  { %236 = vst.msk [vmem:[%s547_s7 + $0x8] sm:$0xff] %vm109_vm0, %v234_v43 }
  0xb0   :  { %246 = vst.msk [vmem:[%s548_s8 + $0x8] sm:$0xff] %vm109_vm0, %v244_v45 }
  0xb2   :  { %v248_v46 = vld [vmem:[#allocation4 + $0x8] sm:$0xff] }
  0xb3   :  { %v254_v47 = vadd.f32 %v291_v35, %v248_v46 }
  0xb5   :  { %256 = vst.msk [vmem:[%s549_s9 + $0x8] sm:$0xff] %vm109_vm0, %v254_v47 }
  0xb6   :  { %269 = vsyncpa [#allocation6], 1 }
  0xb7   :  { %270 = vsyncpa [#allocation8], 1 }
  0xb8   :  { %271 = vsyncpa [#allocation11], 1 }

</bundles_post_ra>
